<compile_context>
chip_gen: v7x
topology: tpu7x:2x2x1
jax: 0.10.0
libtpu: 0.0.40
codegen_flags: <defaults>
</compile_context>

<pallas_src>
import math

import jax
import jax.numpy as jnp
from jax.experimental import pallas as pl
from jax.experimental.pallas import tpu as pltpu


_MIB = 1024 * 1024


def _vmem_config():
    """Pick (resident_tile_budget_bytes, scoped_vmem_limit_bytes) from physical VMEM."""
    try:
        phys = int(pltpu.get_tpu_info().vmem_capacity_bytes)
    except Exception:
        phys = 0  # unknown -> conservative (v7x-safe) settings
    if phys >= 96 * _MIB:            # v5e / v6e: 128 MiB physical VMEM
        return 48 * _MIB, 64 * _MIB
    return 32 * _MIB, 48 * _MIB      # v7x: 64 MiB physical VMEM per TensorCore


_RESIDENT_BUDGET, _VMEM_LIMIT_BYTES = _vmem_config()

# Only split a would-be single-step grid (so v7x megacore can shard the work)
# when the input is at least this big; below that an extra step is pure overhead.
_SPLIT_MIN_BYTES = 1 * _MIB


def _sublane_multiple(dtype):
    # f32 -> 8, bf16/f16 -> 16, int8/fp8 -> 32 (sub-32-bit dtypes pack along sublanes).
    itemsize = jnp.dtype(dtype).itemsize
    return max(8, 32 // max(itemsize, 1))


def _per_elem_resident_bytes(dtype):
    # double-buffered input + double-buffered output (same dtype) + ~2 live f32 temps.
    itemsize = jnp.dtype(dtype).itemsize
    return 4 * itemsize + 8


def _round_up(v, m):
    return -(-v // m) * m


def _cost_estimate(n_elem, n_rows, itemsize):
    # Streaming, mem-bound: one exp per element, one log per reduced row,
    # one HBM read + one HBM write of the whole array.
    return pl.CostEstimate(
        flops=4 * n_elem,
        transcendentals=n_elem + n_rows,
        bytes_accessed=2 * n_elem * itemsize,
    )


# ----------------------------- kernel bodies ---------------------------------


def _log_softmax_last_kernel(x_ref, o_ref):
    # (tile_rows, C) VMEM tile; reduce over the lane (last) axis.
    x = x_ref[...].astype(jnp.float32)
    m = jnp.max(x, axis=-1, keepdims=True)
    lse = jnp.log(jnp.sum(jnp.exp(x - m), axis=-1, keepdims=True))
    o_ref[...] = (x - (m + lse)).astype(o_ref.dtype)


def _log_softmax_channel_kernel(x_ref, o_ref):
    # (1, C, ...) VMEM tile; reduce over the channel axis (axis=1) while the
    # spatial dims stay dense on lanes.  Works for 3-D and 4-D tiles alike.
    x = x_ref[...].astype(jnp.float32)
    m = jnp.max(x, axis=1, keepdims=True)
    lse = jnp.log(jnp.sum(jnp.exp(x - m), axis=1, keepdims=True))
    o_ref[...] = (x - (m + lse)).astype(o_ref.dtype)


# ----------------------------- pallas_call wrappers ---------------------------


def _log_softmax_rows(x2d):
    """Row-wise (last-axis) log_softmax of a 2-D array via a tiled Pallas kernel."""
    rows, cols = x2d.shape
    dtype = x2d.dtype
    itemsize = dtype.itemsize
    sub = _sublane_multiple(dtype)
    per_row = max(cols, 1) * _per_elem_resident_bytes(dtype)

    # The whole reduction axis C must live in a single block.  If even the
    # minimum sublane-aligned tile blows the resident budget, fall back to XLA.
    if per_row * sub > _RESIDENT_BUDGET:
        return jax.nn.log_softmax(x2d, axis=-1)

    tile_rows = max(sub, (_RESIDENT_BUDGET // per_row) // sub * sub)
    if tile_rows >= rows:
        if rows > sub and rows * cols * itemsize >= _SPLIT_MIN_BYTES:
            # Keep >= 2 grid steps so a second TensorCore (v7x) isn't idle.
            tile_rows = _round_up(-(-rows // 2), sub)
        else:
            tile_rows = rows                      # single full-extent block

    grid = (pl.cdiv(rows, tile_rows),)
    return pl.pallas_call(
        _log_softmax_last_kernel,
        out_shape=jax.ShapeDtypeStruct((rows, cols), dtype),
        grid_spec=pltpu.PrefetchScalarGridSpec(
            num_scalar_prefetch=0,
            grid=grid,
            in_specs=[pl.BlockSpec((tile_rows, cols), lambda i: (i, 0))],
            out_specs=pl.BlockSpec((tile_rows, cols), lambda i: (i, 0)),
        ),
        compiler_params=pltpu.CompilerParams(
            dimension_semantics=("parallel",),
            vmem_limit_bytes=_VMEM_LIMIT_BYTES,
        ),
        cost_estimate=_cost_estimate(rows * cols, rows, itemsize),
    )(x2d)


def _log_softmax_channels_3d(x3d):
    """log_softmax over axis=1 of an (N, C, S) array; S kept on lanes (no transpose)."""
    n, c, s = x3d.shape
    dtype = x3d.dtype
    itemsize = dtype.itemsize
    per_elem = _per_elem_resident_bytes(dtype)

    # The whole C axis must fit one block alongside >=128 lanes of S.
    if max(c, 1) * min(s, 128) * per_elem > _RESIDENT_BUDGET:
        return jax.nn.log_softmax(x3d, axis=1)

    per_col = max(c, 1) * per_elem
    max_s = _RESIDENT_BUDGET // per_col
    if max_s >= s:
        tile_s = s
        if n == 1 and s > 128 and c * s * itemsize >= _SPLIT_MIN_BYTES:
            # Split the only batch element across >=2 grid steps for megacore.
            tile_s = max(128, _round_up(-(-s // 2), 128))
            if tile_s >= s:
                tile_s = s
    else:
        tile_s = max(128, (max_s // 128) * 128)   # lane-dense multiple of 128
        tile_s = min(tile_s, s)

    grid = (n, pl.cdiv(s, tile_s))
    return pl.pallas_call(
        _log_softmax_channel_kernel,
        out_shape=jax.ShapeDtypeStruct((n, c, s), dtype),
        grid_spec=pltpu.PrefetchScalarGridSpec(
            num_scalar_prefetch=0,
            grid=grid,
            in_specs=[pl.BlockSpec((1, c, tile_s), lambda i, j: (i, 0, j))],
            out_specs=pl.BlockSpec((1, c, tile_s), lambda i, j: (i, 0, j)),
        ),
        compiler_params=pltpu.CompilerParams(
            dimension_semantics=("parallel", "parallel"),
            vmem_limit_bytes=_VMEM_LIMIT_BYTES,
        ),
        cost_estimate=_cost_estimate(n * c * s, n * s, itemsize),
    )(x3d)


def _log_softmax_channels_4d(x4d):
    """log_softmax over axis=1 of an (N, C, SC, 128) array (small-C fast path).

    The last two dims are fully sublane/lane dense, so the channel reduction is
    an elementwise max/add across C vreg slabs (VALU) instead of a cross-sublane
    XLU reduce over a mostly-padded vreg."""
    n, c, sc, lanes = x4d.shape
    dtype = x4d.dtype
    itemsize = dtype.itemsize
    sub = _sublane_multiple(dtype)
    per_sc_row = max(c, 1) * lanes * _per_elem_resident_bytes(dtype)
    max_sc = max(1, _RESIDENT_BUDGET // per_sc_row)

    if max_sc >= sc:
        tile_sc = sc
        if n == 1 and sc > sub and c * sc * lanes * itemsize >= _SPLIT_MIN_BYTES:
            tile_sc = _round_up(-(-sc // 2), sub)
            if tile_sc >= sc:
                tile_sc = sc
    else:
        tile_sc = max(sub, (max_sc // sub) * sub)
        tile_sc = min(tile_sc, sc)

    grid = (n, pl.cdiv(sc, tile_sc))
    return pl.pallas_call(
        _log_softmax_channel_kernel,
        out_shape=jax.ShapeDtypeStruct((n, c, sc, lanes), dtype),
        grid_spec=pltpu.PrefetchScalarGridSpec(
            num_scalar_prefetch=0,
            grid=grid,
            in_specs=[pl.BlockSpec((1, c, tile_sc, lanes), lambda i, j: (i, 0, j, 0))],
            out_specs=pl.BlockSpec((1, c, tile_sc, lanes), lambda i, j: (i, 0, j, 0)),
        ),
        compiler_params=pltpu.CompilerParams(
            dimension_semantics=("parallel", "parallel"),
            vmem_limit_bytes=_VMEM_LIMIT_BYTES,
        ),
        cost_estimate=_cost_estimate(n * c * sc * lanes, n * sc * lanes, itemsize),
    )(x4d)


def _log_softmax_channels(x3d):
    n, c, s = x3d.shape
    sub = _sublane_multiple(x3d.dtype)
    if c < sub and s % 128 == 0 and s >= 128:
        sc = s // 128
        y = _log_softmax_channels_4d(x3d.reshape(n, c, sc, 128))
        return y.reshape(n, c, s)
    return _log_softmax_channels_3d(x3d)


# ----------------------------- module forward --------------------------------


def module_forward(x):
    """JAX/Pallas equivalent of Module(layers=[]).forward(x):
       y = log_softmax(identity(x), dim=1)."""
    x = jnp.asarray(x)
    ndim = x.ndim
    if ndim == 1:
        # (PyTorch F.log_softmax(x, dim=1) rejects 1-D input; treat as one row.)
        return _log_softmax_rows(x[None, :])[0]
    if ndim == 2:
        # dim=1 is already the last (lane) axis.
        return _log_softmax_rows(x)
    # ndim >= 3: softmax over channel axis 1; flatten spatial dims onto lanes.
    n, c = x.shape[0], x.shape[1]
    s = math.prod(x.shape[2:])
    if s == 1:
        # Degenerate spatial extent -> channel axis is effectively the last axis.
        return _log_softmax_rows(x.reshape(n, c)).reshape(x.shape)
    x3d = x.reshape(n, c, s)          # bitcast reshape, no HBM transpose
    y3d = _log_softmax_channels(x3d)
    return y3d.reshape(x.shape)


# TODO(synk): relprop / getActivations / getRelevances / getMetaData are LRP
# introspection utilities (forward hooks + relevance propagation) with no kernel
# hot path; only the forward pass is implemented here.


if __name__ == "__main__":
    key = jax.random.PRNGKey(0)

    # 4-D NCHW input (log_softmax over the channel dim) -- small-C lane-dense path.
    x4 = jax.random.normal(key, (2, 4, 16, 16), dtype=jnp.float32)
    y4 = module_forward(x4)
    jax.block_until_ready(y4)
    ref4 = jax.nn.log_softmax(x4, axis=1)
    assert y4.shape == x4.shape
    assert jnp.max(jnp.abs(y4 - ref4)) < 1e-5

    # 2-D classifier-logits input (lane reduction path).
    x2 = jax.random.normal(jax.random.PRNGKey(1), (8, 32), dtype=jnp.float32)
    y2 = module_forward(x2)
    jax.block_until_ready(y2)
    ref2 = jax.nn.log_softmax(x2, axis=1)
    assert jnp.max(jnp.abs(y2 - ref2)) < 1e-5

    # Non-aligned 4-D shape exercises the (1, C, S) sublane-reduction path.
    x5 = jax.random.normal(jax.random.PRNGKey(2), (3, 5, 7, 9), dtype=jnp.float32)
    y5 = module_forward(x5)
    jax.block_until_ready(y5)
    ref5 = jax.nn.log_softmax(x5, axis=1)
    assert jnp.max(jnp.abs(y5 - ref5)) < 1e-5

    # bf16 input exercises the dtype-aware tiling / sublane rounding.
    xb = jax.random.normal(jax.random.PRNGKey(3), (2, 4, 16, 16), dtype=jnp.bfloat16)
    yb = module_forward(xb)
    jax.block_until_ready(yb)
    refb = jax.nn.log_softmax(xb.astype(jnp.float32), axis=1)
    assert yb.dtype == jnp.bfloat16
    assert jnp.max(jnp.abs(yb.astype(jnp.float32) - refb)) < 1e-1

    print("KERNEL_OK")
</pallas_src>

<mosaic_0001>
module attributes {stable_mosaic.version = 11 : i64} {
  func.func @_log_softmax_channel_kernel(%arg0: i32, %arg1: i32, %arg2: memref<1x4x2x128xf32, #tpu.memory_space<vmem>>, %arg3: memref<1x4x2x128xf32, #tpu.memory_space<vmem>>) attributes {dimension_semantics = [#tpu.dimension_semantics<parallel>, #tpu.dimension_semantics<parallel>], iteration_bounds = array<i64: 2, 1>, scalar_prefetch = 0 : i64, scratch_operands = 0 : i64, tpu.core_type = #tpu.core_type<tc>, window_params = [{transform_indices = @transform_0, window_bounds = array<i64: 1, 4, 2, 128>}, {transform_indices = @transform_1, window_bounds = array<i64: 1, 4, 2, 128>}]} {
    %c0 = arith.constant 0 : index
    %c0_0 = arith.constant 0 : index
    %c0_1 = arith.constant 0 : index
    %c0_2 = arith.constant 0 : index
    %0 = vector.load %arg2[%c0, %c0_0, %c0_1, %c0_2] : memref<1x4x2x128xf32, #tpu.memory_space<vmem>>, vector<1x4x2x128xf32>
    %cst = arith.constant dense<0xFF800000> : vector<1x2x128xf32>
    %1 = vector.multi_reduction <maximumf>, %0, %cst [1] : vector<1x4x2x128xf32> to vector<1x2x128xf32>
    %2 = vector.shape_cast %1 : vector<1x2x128xf32> to vector<1x1x2x128xf32>
    %3 = vector.broadcast %2 : vector<1x1x2x128xf32> to vector<1x4x2x128xf32>
    %4 = arith.subf %0, %3 : vector<1x4x2x128xf32>
    %5 = math.exp %4 : vector<1x4x2x128xf32>
    %cst_3 = arith.constant dense<0.000000e+00> : vector<1x2x128xf32>
    %6 = vector.multi_reduction <add>, %5, %cst_3 [1] : vector<1x4x2x128xf32> to vector<1x2x128xf32>
    %7 = vector.shape_cast %6 : vector<1x2x128xf32> to vector<1x1x2x128xf32>
    %8 = math.log %7 : vector<1x1x2x128xf32>
    %9 = arith.addf %2, %8 : vector<1x1x2x128xf32>
    %10 = vector.broadcast %9 : vector<1x1x2x128xf32> to vector<1x4x2x128xf32>
    %11 = arith.subf %0, %10 : vector<1x4x2x128xf32>
    %c0_4 = arith.constant 0 : index
    %c0_5 = arith.constant 0 : index
    %c0_6 = arith.constant 0 : index
    %c0_7 = arith.constant 0 : index
    %12 = vector.load %arg3[%c0_4, %c0_5, %c0_6, %c0_7] : memref<1x4x2x128xf32, #tpu.memory_space<vmem>>, vector<1x4x2x128xf32>
    tpu.vector_store %arg3[%c0_4, %c0_5, %c0_6, %c0_7], %11 {strides = array<i32>} : memref<1x4x2x128xf32, #tpu.memory_space<vmem>>, vector<1x4x2x128xf32>,
    return
  }
  func.func @transform_0(%arg0: i32, %arg1: i32) -> (i32, i32, i32, i32) {
    %c0_i32 = arith.constant 0 : i32
    %c0_i32_0 = arith.constant 0 : i32
    %c0_i32_1 = arith.constant 0 : i32
    return %arg0, %c0_i32, %arg1, %c0_i32_0 : i32, i32, i32, i32
  }
  func.func @transform_1(%arg0: i32, %arg1: i32) -> (i32, i32, i32, i32) {
    %c0_i32 = arith.constant 0 : i32
    %c0_i32_0 = arith.constant 0 : i32
    %c0_i32_1 = arith.constant 0 : i32
    return %arg0, %c0_i32, %arg1, %c0_i32_0 : i32, i32, i32, i32
  }
}

</mosaic_0001>

<bundles_post_ra>
// kernel: tpu_custom_call.1
= control target key start
LH: loop header
LB: loop body
LE: loop exit
PB: predicated region body
PF: predicated region fallthrough
CT: control target
= control target key end

     0   :  { %6 = vsyncpa [#allocation3], 0  ;;  %s704_s0 = inlined_call_operand.hbm [shape: f32[2,4,2,128], index: 0, kind: input, shape index: {}]   ;;  %s705_s1 = inlined_call_operand.hbm [shape: f32[2,4,2,128], index: 1, kind: output, shape index: {}]  }
   0x1   :  { %8 = vsyncpa [#allocation3 + $0x1], 0 }
   0x2   :  { %9 = vsyncpa [#allocation4], 0 }
   0x3   :  { %11 = vsyncpa [#allocation4 + $0x1], 0  ;;  %s517_s6 = smov 0   ;;  %s519_s7 = smov 0  }
   0x4   :  { %s521_s8 = smov 0   ;;  %s523_s9 = smov 0  }
   0x5   :  { %s525_s10 = smov 0   ;;  %s527_s11 = smov 0  }
   0x6 LB: > { %s294_s12 = sadd.s32 4294967295, %s499_s11   ;;  %s295_s13 = sadd.s32 4294967294, %s499_s11   ;;  %s499_s11 = sphi %s527_s11, %s17_s11   ;;  %s495_s10 = sphi %s525_s10, %s720_s10   ;;  %s491_s9 = sphi %s523_s9, %s719_s9   ;;  %s487_s8 = sphi %s521_s8, %s718_s8   ;;  %s483_s7 = sphi %s519_s7, %s717_s7   ;;  %s479_s6 = sphi %s517_s6, %s716_s6  }
   0x7   : > { %s29_s14 = sadd.s32 1, %s495_s10  ;;  %s38_s15 = sadd.s32 1, %s487_s8 }
   0x8   : > { %p31_p0 = scmp.ge.s32.totalorder %s29_s14, 2  ;;  %p45_p1 = scmp.ne.s32.totalorder %s487_s8, %s483_s7 }
   0x9   : > { %p46_p2 = scmp.eq.s32.totalorder %s499_s11, 0  ;;  %p51_p3 = scmp.ne.s32.totalorder %s483_s7, %s479_s6 }
   0xa   : > { %s722_s14 = smov (%p31_p0, %s29_s14), 0  ;;  %p52_p5 = scmp.eq.s32.totalorder %s294_s12, 0 }
   0xb   : > { %p558_p4 = por %p46_p2, %p45_p1  ;;  %s33_s17 = ssub.s32 %s495_s10, %s722_s14 }
   0xc   : > { %p77_p6 = scmp.eq.s32.totalorder %s294_s12, 1  ;;  %p36_p7 = scmp.eq.s32.totalorder %s33_s17, 0 }
   0xd   : > { %p564_p8 = por %p52_p5, %p51_p3  ;;  %p83_p10 = scmp.eq.s32.totalorder %s295_s13, 1 }
   0xe   : > { %p568_p9 = por %p77_p6, %p45_p1  ;;  %p323_p13 = scmp.lt.s32.totalorder %s499_s11, 2 }
   0xf   : > { %s573_s20 = scalar_select %p36_p7, %s487_s8, %s38_s15  }
  0x10   : > { %s709_s19 = scalar_select %p568_p9, 1, 0 }
  0x11   : > { %p575_p11 = por %p83_p10, %p51_p3  ;;  %s103_s22 = sand.u32 1, %s487_s8  }
  0x12   : > { %s298_s23 = sshll.u32 %s103_s22, 3  ;;  %s309_s24 = sshll.u32 %s495_s10, 7 }
  0x13   : > { %s710_s21 = scalar_select %p575_p11, 1, 0 }
  0x14   : > { %s586_s27 = scalar_lea.hbm %s704_s0, %s309_s24  ;;  %s107_s28 = scalar_lea.vmem [#allocation2], %s298_s23 }
  0x15   : > { %s115_s29 = sshll.u32 %s107_s28, 4  ;;  %p592_p0 = pnand %p323_p13, %p558_p4  ;;  %s588_s29 = int_to_ptr.vmem [resolvable:$true] %s115_s29 }
  0x16   : > { %s597_s2 = scalar_lea.sflag [#allocation3], %s103_s22  ;;  %s387_s3 = scalar_lea.hbm %s586_s27, 128 }
  0x17   : > { %p388_p2 = scmp.ne.s32.totalorder %s586_s27, %s387_s3  ;;  %p389_p3 = pneg %p592_p0 }
  0x18   : > { %s392_s12 = scalar_lea.hbm %s704_s0, 256  ;;  %p393_p4 = scmp.lt.u32.totalorder %s586_s27, %s704_s0 }
  0x19   : > { %p390_p5 = pnand %p389_p3, %p388_p2  ;;  %p394_p7 = scmp.lt.u32.totalorder %s392_s12, %s387_s3 }
  0x1a   : > { %p396_p13 = scmp.lt.u32.totalorder %s387_s3, %s586_s27 }
  0x1b   : > { %p391_p6 = pneg %p390_p5  ;;  %p395_p10 = por %p394_p7, %p393_p4 }
  0x1d   : > { %p397_p12 = por %p396_p13, %p395_p10 }
  0x1f   : > { %p398_p1 = pnand %p397_p12, %p391_p6 }
  0x21   : > { %401 = shalt.err (!%p398_p1)
}
  0x22   : > { %s402_s16 = scalar_lea.vmem %s588_s29, 128  ;;  %s501_s17 = smov [#allocation2]  }
  0x23   : > { %p403_p2 = scmp.ne.s32.totalorder %s588_s29, %s402_s16  ;;  %s407_s22 = sshll.u32 %s501_s17, 4  ;;  %s408_s22 = int_to_ptr.vmem [resolvable:$false] %s407_s22 }
  0x24   : > { %s409_s23 = scalar_lea.vmem %s408_s22, 256  ;;  %p410_p9 = scmp.lt.s32.totalorder %s588_s29, %s408_s22 }
  0x25   : > { %p405_p5 = pnand %p403_p2, %p389_p3  ;;  %p411_p4 = scmp.lt.s32.totalorder %s409_s23, %s402_s16 }
  0x27   : > { %p406_p11 = pneg %p405_p5  ;;  %p412_p7 = por %p411_p4, %p410_p9 }
  0x29   : > { %p413_p10 = pnand %p412_p7, %p406_p11 }
  0x2b   : > { %416 = shalt.err (!%p413_p10)
}
  0x2c   : > { %s502_s24 = smov 32   ;;  %s503_s25 = smov 2  }
  0x2d   : > { %318 = dma.hbm_to_vmem [thread:$0]  (!%p592_p0), %s586_s27, 128, %s588_s29, %s597_s2, %s502_s24, %s502_s24, %s503_s25  }
  0x2e   : > { %p123_p12 = scmp.lt.s32.totalorder %s499_s11, 3  ;;  %p712_p1 = scmp.ge.s32.totalorder %s499_s11, 1 }
  0x30   : > { %p124_p3 = pnand %p712_p1, %p123_p12 }
  0x31   : > { %s629_s26 = sand.u32 (!%p124_p3), 1, %s483_s7  }
  0x32   : > { %127 = sbr.rel (%p124_p3) target bundleno = 121 (0x79), region = 24  ;;  %s302_s28 = sshll.u32 (!%p124_p3), %s629_s26, 3 }
  0x33   : > { %s130_s3 = scalar_lea.sflag (!%p124_p3), [#allocation3], %s629_s26  ;;  %s133_s4 = scalar_lea.vmem (!%p124_p3), [#allocation2], %s302_s28 }
  0x39   : > { %470 = dma.done.wait (%p564_p8), %s130_s3, 128  }
  0x3a   : > { %472 = vsyncadd (%p564_p8), %s130_s3, 4294967168  ;;  %vm156_vm0 = vcmask 1041408   ;;  %v152_v0 = vld [vmem:[%s133_s4] sm:$0x3]  ;;  %v153_v1 = vld [vmem:[%s133_s4 + $0x2] sm:$0x3] }
  0x3b   : > { %v154_v2 = vld [vmem:[%s133_s4 + $0x4] sm:$0x3]  ;;  %v155_v3 = vld [vmem:[%s133_s4 + $0x6] sm:$0x3]  ;;  %v157_v4 = vsel %vm156_vm0, %v152_v0, -inf  ;;  %v158_v5 = vsel %vm156_vm0, %v153_v1, -inf }
  0x3c   : > { %v159_v6 = vsel %vm156_vm0, %v154_v2, -inf  ;;  %v160_v7 = vsel %vm156_vm0, %v155_v3, -inf  ;;  %v161_v8 = vmax.f32 %v157_v4, %v158_v5  ;;  %s151_s18 = scalar_lea.vmem [#allocation5], %s302_s28  ;;  %s310_s29 = sshll.u32 %s491_s9, 7 }
  0x3d   : > { %v162_v9 = vmax.f32 %v159_v6, %v160_v7  ;;  %s209_s27 = sshll.u32 %s151_s18, 4  ;;  %s655_s5 = scalar_lea.hbm %s705_s1, %s310_s29  ;;  %s650_s27 = int_to_ptr.vmem [resolvable:$true] %s209_s27 }
  0x3e   : > { %s195_s9 = scalar_lea.sflag [#allocation4], %s629_s26  ;;  %s417_s12 = scalar_lea.vmem %s650_s27, 128 }
  0x3f   : > { %v163_v10 = vmax.f32 %v161_v8, %v162_v9  ;;  %p418_p8 = scmp.ne.s32.totalorder %s650_s27, %s417_s12  ;;  %p713_p9 = scmp.ne.s32.totalorder %s709_s19, 0 }
  0x40   : > { %s504_s13 = smov [#allocation5]  }
  0x41   : > { %v164_v11 = vsub.f32 %v152_v0, %v163_v10  ;;  %v165_v12 = vsub.f32 %v153_v1, %v163_v10  ;;  %v166_v13 = vsub.f32 %v154_v2, %v163_v10  ;;  %v167_v14 = vsub.f32 %v155_v3, %v163_v10  ;;  %p419_p11 = pnand %p418_p8, %p713_p9  ;;  %s421_s15 = sshll.u32 %s504_s13, 4  ;;  %s422_s15 = int_to_ptr.vmem [resolvable:$false] %s421_s15 }
  0x42   : > { %s423_s16 = scalar_lea.vmem %s422_s15, 256  ;;  %p424_p6 = scmp.lt.s32.totalorder %s650_s27, %s422_s15 }
  0x43   : > { %v168_v15 = vmul.f32 1.442695, %v164_v11  ;;  %v170_v16 = vmul.f32 1.442695, %v165_v12  ;;  %v172_v17 = vmul.f32 1.442695, %v166_v13  ;;  %p420_p0 = pneg %p419_p11  ;;  %p425_p13 = scmp.lt.s32.totalorder %s423_s16, %s417_s12 }
  0x44   : > { %v174_v18 = vmul.f32 1.442695, %v167_v14 }
  0x45   : > { %377 = vpow2.f32 %v168_v15  ;;  %p426_p2 = por %p425_p13, %p424_p6 }
  0x46   : > { %379 = vpow2.f32 %v170_v16 }
  0x47   : > { %381 = vpow2.f32 %v172_v17  ;;  %p427_p5 = pnand %p426_p2, %p420_p0 }
  0x48   : > { %383 = vpow2.f32 %v174_v18 }
  0x4f   : > { %v378_v19 = vpop.eup %377 }
  0x50   : > { %v380_v20 = vpop.eup %379  ;;  %v176_v21 = vsel %vm156_vm0, %v378_v19, 0.0 }
  0x51   : > { %v382_v22 = vpop.eup %381  ;;  %v177_v23 = vsel %vm156_vm0, %v380_v20, 0.0 }
  0x52   : > { %v384_v24 = vpop.eup %383  ;;  %v178_v25 = vadd.f32 %v177_v23, %v176_v21  ;;  %v179_v26 = vsel %vm156_vm0, %v382_v22, 0.0 }
  0x53   : > { %v181_v27 = vsel %vm156_vm0, %v384_v24, 0.0 }
  0x54   : > { %v180_v28 = vadd.f32 %v179_v26, %v178_v25 }
  0x56   : > { %v182_v29 = vadd.f32 %v181_v27, %v180_v28 }
  0x58   : > { %385 = vlog2.f32 %v182_v29 }
  0x62   : > { %v386_v30 = vpop.eup %385 }
  0x63   : > { %v184_v31 = vmul.f32 0.6931472, %v386_v30 }
  0x65   : > { %v185_v32 = vadd.f32 %v184_v31, %v163_v10 }
  0x67   : > { %v186_v33 = vsub.f32 %v152_v0, %v185_v32  ;;  %v187_v34 = vsub.f32 %v153_v1, %v185_v32  ;;  %v188_v35 = vsub.f32 %v154_v2, %v185_v32  ;;  %v189_v36 = vsub.f32 %v155_v3, %v185_v32 }
  0x69   : > { %190 = vst [vmem:[%s151_s18] sm:$0x3] %v186_v33  ;;  %191 = vst [vmem:[%s151_s18 + $0x2] sm:$0x3] %v187_v34 }
  0x6a   : > { %192 = vst [vmem:[%s151_s18 + $0x4] sm:$0x3] %v188_v35  ;;  %193 = vst [vmem:[%s151_s18 + $0x6] sm:$0x3] %v189_v36 }
  0x6b   : > { %430 = shalt.err (!%p427_p5)
}
  0x6c   : > { %s431_s17 = scalar_lea.hbm %s655_s5, 128  ;;  %s435_s24 = scalar_lea.hbm %s705_s1, 256 }
  0x6d   : > { %p432_p4 = scmp.ne.s32.totalorder %s655_s5, %s431_s17  ;;  %p436_p12 = scmp.lt.u32.totalorder %s655_s5, %s705_s1 }
  0x6e   : > { %p437_p1 = scmp.lt.u32.totalorder %s435_s24, %s431_s17  ;;  %p439_p8 = scmp.lt.u32.totalorder %s431_s17, %s655_s5 }
  0x6f   : > { %p433_p7 = pnand %p432_p4, %p713_p9 }
  0x70   : > { %p438_p3 = por %p437_p1, %p436_p12 }
  0x71   : > { %p434_p10 = pneg %p433_p7 }
  0x72   : > { %p440_p11 = por %p439_p8, %p438_p3 }
  0x74   : > { %p441_p0 = pnand %p440_p11, %p434_p10 }
  0x76   : > { %444 = shalt.err (!%p441_p0)
}
  0x77   : > { %s505_s3 = smov 32   ;;  %s506_s4 = smov 2  }
  0x78   : > { %313 = dma.vmem_to_hbm [thread:$0]  (%p713_p9), %s650_s27, 128, %s655_s5, %s195_s9, %s505_s3, %s505_s3, %s506_s4  }
  0x79 PF: > { %s224_s18 = sand.u32 1, %s479_s6   ;;  %p714_p6 = scmp.ne.s32.totalorder %s710_s21, 0 }
  0x7a   : > { %p715_p13 = scmp.ge.s32.totalorder %s499_s11, 2  ;;  %s225_s29 = scalar_lea.sflag [#allocation4], %s224_s18 }
  0x7c   : > { %p320_p2 = pnand %p715_p13, %p714_p6 }
  0x7e   : > { %474 = dma.done.wait (!%p320_p2), %s225_s29, 128  }
  0x7f   : > { %476 = vsyncadd (!%p320_p2), %s225_s29, 4294967168  ;;  %s17_s11 = sadd.s32 1, %s499_s11   ;;  %s716_s6 = smov %s483_s7 }
  0x80   : > { %p14_p5 = scmp.ge.s32.totalorder %s17_s11, 4   ;;  %s717_s7 = smov %s487_s8 }
  0x81   : > { %s718_s8 = smov %s573_s20  ;;  %s719_s9 = smov %s495_s10 }
  0x82   : > { %s720_s10 = smov %s722_s14  ;;  %16 = sbr.rel (!%p14_p5) target bundleno = 6 (0x6), region = 69 }
  0x89   :  { %230 = vsyncpa [#allocation3], 1 }
  0x8a   :  { %232 = vsyncpa [#allocation3 + $0x1], 1 }
  0x8b   :  { %233 = vsyncpa [#allocation4], 1 }
  0x8c   :  { %235 = vsyncpa [#allocation4 + $0x1], 1 }

</bundles_post_ra>
